<compile_context>
chip_gen: v6e
topology: v6e:2x2x1
jax: 0.10.0
libtpu: 0.0.40
codegen_flags: <defaults>
</compile_context>

<pallas_src>
import functools

import jax
import jax.numpy as jnp
from jax import lax
from jax.experimental import pallas as pl
from jax.experimental.pallas import tpu as pltpu


def mhfa_kernel(x_ref, wk_ref, wv_ref, Wkv_ref, bk_ref, bv_ref,
                Wa_ref, ba_ref, Wp_ref, bp_ref, out_ref,
                kc_acc, vc_acc, *, layers_per_step, split_v_mix, exact_softmax):
    """Streamed layer mix + MHFA attention pooling.

    x_ref    : (layers_per_step, T, D) bf16 slab of stacked layer reps
    wk/wv    : (L,) f32 in SMEM, softmaxed layer-mixing weights
    Wkv      : (D, 2C) bf16  [cmp_linear_k | cmp_linear_v] weights
    bk/bv    : (1, C) f32 biases
    Wa/ba    : (C, H) bf16 / (1, H) f32   attention head
    Wp/bp    : (H*C, E) bf16 (head-major rows) / (1, E) f32   pooling FC
    out_ref  : (1, 1, E) f32
    kc_acc   : (T, C) f32 scratch
    vc_acc   : (T, C) f32 scratch (fused) or (T, D) f32 (split_v_mix)
    """
    step = pl.program_id(1)
    n_steps = pl.num_programs(1)
    C = bk_ref.shape[-1]
    H = ba_ref.shape[-1]
    E = bp_ref.shape[-1]
    f32, bf16 = jnp.float32, jnp.bfloat16

    @pl.when(step == 0)
    def _():
        kc_acc[...] = jnp.zeros_like(kc_acc)
        vc_acc[...] = jnp.zeros_like(vc_acc)

    # ---- streamed, layer-weighted compression --------------------------------
    for j in range(layers_per_step):
        layer = step * layers_per_step + j
        xj = x_ref[j]                                                # (T, D) bf16
        if split_v_mix:
            # v5e: k mix on the MXU, v mix on the VPU (keeps both units at
            # ~half of the per-step slab-DMA time).
            kj = jnp.dot(xj, Wkv_ref[:, 0:C],
                         preferred_element_type=f32)                 # (T, C)
            kc_acc[...] += wk_ref[layer] * kj
            vc_acc[...] += wv_ref[layer] * xj.astype(f32)            # (T, D)
        else:
            # v6e / v7x: both mixes ride a single bf16 (T,D)@(D,2C) MXU matmul.
            kvj = jnp.dot(xj, Wkv_ref[...],
                          preferred_element_type=f32)                # (T, 2C)
            kc_acc[...] += wk_ref[layer] * kvj[:, 0:C]
            vc_acc[...] += wv_ref[layer] * kvj[:, C:2 * C]

    # ---- attention pooling + FC, once per batch element -----------------------
    @pl.when(step == n_steps - 1)
    def _():
        kc = kc_acc[...] + bk_ref[...]                               # (T, C)
        if split_v_mix:
            vc = jnp.dot(vc_acc[...].astype(bf16), Wkv_ref[:, C:2 * C],
                         preferred_element_type=f32) + bv_ref[...]   # (T, C)
        else:
            vc = vc_acc[...] + bv_ref[...]                           # (T, C)

        # per-head logits; softmax over frames (torch dim=1 == T)
        att = jnp.dot(kc.astype(bf16), Wa_ref[...],
                      preferred_element_type=f32) + ba_ref[...]      # (T, H)
        m = jnp.max(att, axis=0, keepdims=True)                      # (1, H)
        p = jnp.exp(att - m)                                         # (T, H)
        denom = jnp.sum(p, axis=0, keepdims=True)                    # (1, H)
        if exact_softmax:
            att_n = p / denom
        else:
            att_n = p * pl.reciprocal(denom, approx=True)            # EUP slot

        # pooled[h, c] = sum_t att_n[t, h] * vc[t, c]   (contract frame dim;
        # f32 operands — tiny matmul, known-good Mosaic lowering)
        pooled = lax.dot_general(att_n, vc, (((0,), (0,)), ((), ())),
                                 preferred_element_type=f32)         # (H, C)

        # head-major flatten + single final contraction against (H*C, E).
        # TODO(synk): a 2-contracting-dim dot_general against fc_w reshaped
        # (H, C, E) would drop the H lane-concats, but that shape is not
        # reliably lowered by Mosaic; the concat is a one-time epilogue cost.
        pooled_flat = jnp.concatenate(
            [pooled[h:h + 1, :] for h in range(H)], axis=1)          # (1, H*C)
        out = jnp.dot(pooled_flat.astype(bf16), Wp_ref[...],
                      preferred_element_type=f32) + bp_ref[...]      # (1, E)
        out_ref[...] = out.reshape(1, 1, E)


def mhfa_pallas(x_bltd, params, *, layers_per_step=None, split_v_mix=None,
                exact_softmax=False):
    """MHFA pooling back-end.  x_bltd: [B, L, T, D] stacked layer reps."""
    B, L, T, D = x_bltd.shape
    C = params['cmp_k_w'].shape[0]
    H = params['att_w'].shape[0]
    E = params['fc_w'].shape[0]
    f32, bf16 = jnp.float32, jnp.bfloat16

    # x traffic stays bf16 (the kernel is HBM-bandwidth bound on x); mixes and
    # softmax accumulate in f32.  This is a stated precision contract vs the
    # all-f32 torch reference (test tolerance ~1e-2), not a bug.
    if x_bltd.dtype != bf16:
        x_bltd = x_bltd.astype(bf16)

    # softmax over the L layer-mixing weights (tiny parameter preprocessing).
    wk = jax.nn.softmax(params['weights_k'].astype(f32), axis=-1)
    wv = jax.nn.softmax(params['weights_v'].astype(f32), axis=-1)

    # torch nn.Linear weight is (out, in); kernel uses (in, out).  Both
    # compression weights ride in one bf16 (D, 2C) MXU operand.
    Wkv = jnp.concatenate([params['cmp_k_w'].T, params['cmp_v_w'].T],
                          axis=1).astype(bf16)                      # (D, 2C)
    bk = params['cmp_k_b'][None, :].astype(f32)                     # (1, C)
    bv = params['cmp_v_b'][None, :].astype(f32)                     # (1, C)
    Wa = params['att_w'].T.astype(bf16)                             # (C, H)
    ba = params['att_b'][None, :].astype(f32)                       # (1, H)
    Wp = params['fc_w'].T.astype(bf16)                              # (H*C, E)
    bp = params['fc_b'][None, :].astype(f32)                        # (1, E)

    if split_v_mix is None:
        # v5e's 197 TF/s MXU makes (T,D)@(D,2C)/step ~equal to the slab DMA;
        # keep the v mix on the VPU there.  v6e/v7x/v5p: fully fused.
        try:
            kind = jax.devices()[0].device_kind.lower()
        except Exception:
            kind = ""
        split_v_mix = ("v5 lite" in kind) or ("v5e" in kind) or ("v5lite" in kind)

    if layers_per_step is None:
        # amortize the ~0.35 us/step grid overhead over two layer slabs.
        layers_per_step = 2 if (L % 2 == 0) else 1
    assert L % layers_per_step == 0, (L, layers_per_step)
    n_steps = L // layers_per_step

    # ---- VMEM budget with a per-generation cap (v7x: 64 MiB / TensorCore) ----
    try:
        phys_vmem = int(pltpu.get_tpu_info().vmem_capacity_bytes)
    except Exception:
        phys_vmem = 64 << 20
    x_slab = layers_per_step * T * D * 2                            # bf16
    scratch = T * C * 4 + (T * D * 4 if split_v_mix else T * C * 4)
    weights = (D * 2 * C + C * H + H * C * E) * 2 + (2 * C + H + E) * 4
    budget = 3 * x_slab + scratch + 2 * weights + 2 * E * 4 + (8 << 20)
    vmem_limit = int(min(max(budget, 32 << 20), int(0.85 * phys_vmem)))

    mm_cols = C if split_v_mix else 2 * C
    flops = (B * L * (2 * T * D * mm_cols + 4 * T * mm_cols
                      + (2 * T * D if split_v_mix else 0))
             + B * (2 * T * C * H + 2 * T * H * C + 2 * H * C * E
                    + (2 * T * D * C if split_v_mix else 0)))
    cost = pl.CostEstimate(
        flops=flops, transcendentals=B * T * H,
        bytes_accessed=B * L * T * D * 2 + weights + B * E * 4)

    kernel = functools.partial(mhfa_kernel, layers_per_step=layers_per_step,
                               split_v_mix=split_v_mix,
                               exact_softmax=exact_softmax)
    scratch_shapes = [
        pltpu.VMEM((T, C), f32),                                    # k mix (compressed)
        pltpu.VMEM((T, D) if split_v_mix else (T, C), f32),         # v mix
    ]

    def build(use_buffering):
        def const_spec(shape):
            kw = {"pipeline_mode": pl.Buffered(1)} if use_buffering else {}
            return pl.BlockSpec(shape, lambda b, s: (0, 0), **kw)
        x_kw = {"pipeline_mode": pl.Buffered(3)} if use_buffering else {}
        in_specs = [
            # one (layers_per_step, T, D) slab per grid step
            pl.BlockSpec((None, layers_per_step, T, D),
                         lambda b, s: (b, s, 0, 0), **x_kw),
            pl.BlockSpec(memory_space=pltpu.MemorySpace.SMEM),      # softmax(weights_k)
            pl.BlockSpec(memory_space=pltpu.MemorySpace.SMEM),      # softmax(weights_v)
            const_spec((D, 2 * C)),                                 # [Wk | Wv] bf16
            const_spec((1, C)), const_spec((1, C)),                 # bk, bv
            const_spec((C, H)), const_spec((1, H)),                 # att head
            const_spec((H * C, E)), const_spec((1, E)),             # pooling FC
        ]
        return pl.pallas_call(
            kernel,
            out_shape=jax.ShapeDtypeStruct((B, 1, E), f32),
            grid=(B, n_steps),
            in_specs=in_specs,
            out_specs=pl.BlockSpec((1, 1, E), lambda b, s: (b, 0, 0)),
            scratch_shapes=scratch_shapes,
            compiler_params=pltpu.CompilerParams(
                dimension_semantics=("parallel", "arbitrary"),
                vmem_limit_bytes=vmem_limit),
            cost_estimate=cost)

    args = (x_bltd, wk, wv, Wkv, bk, bv, Wa, ba, Wp, bp)
    try:
        # single-buffered constant weights + 3-deep pipeline on x, so the next
        # batch element's slabs prefetch behind the per-batch epilogue.
        out = build(True)(*args)
    except Exception:
        # TODO(synk): pl.Buffered pipeline_mode unsupported on this jax build;
        # fall back to default double-buffering (correct, slightly more VMEM).
        out = build(False)(*args)
    return out.reshape(B, E)


def mhfa_ref(x_bltd, params):
    """Pure-JAX reference with PyTorch MHFA semantics (x in [B, L, T, D])."""
    x = x_bltd.astype(jnp.float32)
    wk = jax.nn.softmax(params['weights_k'], axis=-1)
    wv = jax.nn.softmax(params['weights_v'], axis=-1)
    k = jnp.einsum('bltd,l->btd', x, wk)
    v = jnp.einsum('bltd,l->btd', x, wv)
    k = k @ params['cmp_k_w'].T + params['cmp_k_b']
    v = v @ params['cmp_v_w'].T + params['cmp_v_b']
    att = k @ params['att_w'].T + params['att_b']           # (B, T, H)
    att = jax.nn.softmax(att, axis=1)
    pooled = jnp.einsum('bth,btc->bhc', att, v)             # (B, H, C)
    flat = pooled.reshape(pooled.shape[0], -1)              # head-major flatten
    return flat @ params['fc_w'].T + params['fc_b']


def _make_params(key, L, D, H, C, E):
    ks = jax.random.split(key, 8)
    return {
        'weights_k': jnp.ones((L,), jnp.float32),           # torch.ones(nb_layer)
        'weights_v': jnp.ones((L,), jnp.float32),
        'cmp_k_w': 0.1 * jax.random.normal(ks[0], (C, D), jnp.float32),
        'cmp_k_b': 0.1 * jax.random.normal(ks[1], (C,), jnp.float32),
        'cmp_v_w': 0.1 * jax.random.normal(ks[2], (C, D), jnp.float32),
        'cmp_v_b': 0.1 * jax.random.normal(ks[3], (C,), jnp.float32),
        'att_w':   0.1 * jax.random.normal(ks[4], (H, C), jnp.float32),
        'att_b':   0.1 * jax.random.normal(ks[5], (H,), jnp.float32),
        'fc_w':    0.1 * jax.random.normal(ks[6], (E, H * C), jnp.float32),
        'fc_b':    0.1 * jax.random.normal(ks[7], (E,), jnp.float32),
    }


if __name__ == "__main__":
    # Small shapes consistent with the module: B=batch, D=encoder_embed_dim,
    # T=frames (<= ~1000 for the 20 s cap), L=encoder_layers+1, H=head_nb,
    # C=MHFA compression dim (128 in the module), E=embed_dim.
    B, D, T = 2, 32, 16
    H, C, E = 4, 128, 32
    key = jax.random.PRNGKey(0)
    k_p1, k_x1, k_p2, k_x2 = jax.random.split(key, 4)

    def check(x, params, **kw):
        out = jax.block_until_ready(mhfa_pallas(x, params, **kw))
        ref = mhfa_ref(x, params)
        assert out.shape == ref.shape, (out.shape, ref.shape)
        err = float(jnp.max(jnp.abs(out - ref)))
        assert jnp.allclose(out, ref, atol=2e-2, rtol=2e-2), err

    # 1) L=5 (odd -> 1 layer/step), device-auto layer-mix placement.
    L1 = 5
    p1 = _make_params(k_p1, L1, D, H, C, E)
    x1 = jax.random.normal(k_x1, (B, L1, T, D), jnp.float32).astype(jnp.bfloat16)
    check(x1, p1)

    # 2) L=6 (even -> 2 layers/step), fully fused MXU layer mix (v6e/v7x path).
    L2 = 6
    p2 = _make_params(k_p2, L2, D, H, C, E)
    x2 = jax.random.normal(k_x2, (B, L2, T, D), jnp.float32).astype(jnp.bfloat16)
    check(x2, p2, split_v_mix=False)

    # 3) same inputs, v5e-style split mix + exact softmax normalization.
    check(x2, p2, split_v_mix=True, exact_softmax=True)

    print("KERNEL_OK")
</pallas_src>

<mosaic_0001>
module attributes {stable_mosaic.version = 11 : i64} {
  func.func @mhfa_kernel(%arg0: i32, %arg1: i32, %arg2: memref<1x1x16x32xbf16, #tpu.memory_space<vmem>>, %arg3: memref<5xf32, #tpu.memory_space<smem>>, %arg4: memref<5xf32, #tpu.memory_space<smem>>, %arg5: memref<32x256xbf16, #tpu.memory_space<vmem>>, %arg6: memref<1x128xf32, #tpu.memory_space<vmem>>, %arg7: memref<1x128xf32, #tpu.memory_space<vmem>>, %arg8: memref<128x4xbf16, #tpu.memory_space<vmem>>, %arg9: memref<1x4xf32, #tpu.memory_space<vmem>>, %arg10: memref<512x32xbf16, #tpu.memory_space<vmem>>, %arg11: memref<1x32xf32, #tpu.memory_space<vmem>>, %arg12: memref<1x1x32xf32, #tpu.memory_space<vmem>>, %arg13: memref<16x128xf32, #tpu.memory_space<vmem>>, %arg14: memref<16x128xf32, #tpu.memory_space<vmem>>) attributes {dimension_semantics = [#tpu.dimension_semantics<parallel>, #tpu.dimension_semantics<arbitrary>], iteration_bounds = array<i64: 2, 5>, scalar_prefetch = 0 : i64, scratch_operands = 2 : i64, tpu.core_type = #tpu.core_type<tc>, window_params = [{transform_indices = @transform_0, window_bounds = array<i64: 1, 1, 16, 32>}, {transform_indices = @transform_1, window_bounds = array<i64: 5>}, {transform_indices = @transform_2, window_bounds = array<i64: 5>}, {pipeline_mode = #tpu.pipeline_mode<synchronous>, transform_indices = @transform_3, window_bounds = array<i64: 32, 256>}, {pipeline_mode = #tpu.pipeline_mode<synchronous>, transform_indices = @transform_4, window_bounds = array<i64: 1, 128>}, {pipeline_mode = #tpu.pipeline_mode<synchronous>, transform_indices = @transform_5, window_bounds = array<i64: 1, 128>}, {pipeline_mode = #tpu.pipeline_mode<synchronous>, transform_indices = @transform_6, window_bounds = array<i64: 128, 4>}, {pipeline_mode = #tpu.pipeline_mode<synchronous>, transform_indices = @transform_7, window_bounds = array<i64: 1, 4>}, {pipeline_mode = #tpu.pipeline_mode<synchronous>, transform_indices = @transform_8, window_bounds = array<i64: 512, 32>}, {pipeline_mode = #tpu.pipeline_mode<synchronous>, transform_indices = @transform_9, window_bounds = array<i64: 1, 32>}, {transform_indices = @transform_10, window_bounds = array<i64: 1, 1, 32>}]} {
    %c0_i32 = arith.constant 0 : i32
    %0 = arith.cmpi eq, %arg1, %c0_i32 : i32
    %1 = arith.extui %0 : i1 to i32
    %c0_i32_0 = arith.constant 0 : i32
    %2 = arith.cmpi ne, %1, %c0_i32_0 : i32
    scf.if %2 {
      %cst_16 = arith.constant 0.000000e+00 : f32
      %28 = vector.broadcast %cst_16 : f32 to vector<16x128xf32>
      %c0_17 = arith.constant 0 : index
      %c0_18 = arith.constant 0 : index
      %29 = vector.load %arg13[%c0_17, %c0_18] : memref<16x128xf32, #tpu.memory_space<vmem>>, vector<16x128xf32>
      tpu.vector_store %arg13[%c0_17, %c0_18], %28 {strides = array<i32>} : memref<16x128xf32, #tpu.memory_space<vmem>>, vector<16x128xf32>,
      %cst_19 = arith.constant 0.000000e+00 : f32
      %30 = vector.broadcast %cst_19 : f32 to vector<16x128xf32>
      %c0_20 = arith.constant 0 : index
      %c0_21 = arith.constant 0 : index
      %31 = vector.load %arg14[%c0_20, %c0_21] : memref<16x128xf32, #tpu.memory_space<vmem>>, vector<16x128xf32>
      tpu.vector_store %arg14[%c0_20, %c0_21], %30 {strides = array<i32>} : memref<16x128xf32, #tpu.memory_space<vmem>>, vector<16x128xf32>,
    } else {
    }
    %c1_i32 = arith.constant 1 : i32
    %3 = arith.muli %arg1, %c1_i32 : i32
    %c0_i32_1 = arith.constant 0 : i32
    %4 = arith.addi %3, %c0_i32_1 : i32
    %c0 = arith.constant 0 : index
    %c0_2 = arith.constant 0 : index
    %c0_3 = arith.constant 0 : index
    %c0_4 = arith.constant 0 : index
    %5 = vector.load %arg2[%c0, %c0_2, %c0_3, %c0_4] : memref<1x1x16x32xbf16, #tpu.memory_space<vmem>>, vector<1x1x16x32xbf16>
    %6 = vector.shape_cast %5 : vector<1x1x16x32xbf16> to vector<16x32xbf16>
    %c0_5 = arith.constant 0 : index
    %c0_6 = arith.constant 0 : index
    %7 = vector.load %arg5[%c0_5, %c0_6] : memref<32x256xbf16, #tpu.memory_space<vmem>>, vector<32x256xbf16>
    %cst = arith.constant dense<0.000000e+00> : vector<16x256xf32>
    %8 = tpu.matmul %6, %7, %cst {dimension_numbers = #tpu.dot_dimension_numbers<[1], [0], [0], [1], [0, 0, 1, 1], [], []>} : vector<16x32xbf16>, vector<32x256xbf16>, vector<16x256xf32> -> vector<16x256xf32>
    %c0_7 = arith.constant 0 : index
    %c0_8 = arith.constant 0 : index
    %9 = vector.load %arg13[%c0_7, %c0_8] : memref<16x128xf32, #tpu.memory_space<vmem>>, vector<16x128xf32>
    %10 = arith.index_cast %4 : i32 to index
    %11 = memref.load %arg3[%10] : memref<5xf32, #tpu.memory_space<smem>>
    %12 = vector.extract_strided_slice %8 {offsets = [0, 0], sizes = [16, 128], strides = [1, 1]} : vector<16x256xf32> to vector<16x128xf32>
    %13 = vector.broadcast %11 : f32 to vector<16x128xf32>
    %14 = arith.mulf %13, %12 : vector<16x128xf32>
    %15 = arith.addf %9, %14 : vector<16x128xf32>
    %c0_9 = arith.constant 0 : index
    %c0_10 = arith.constant 0 : index
    %16 = vector.load %arg13[%c0_9, %c0_10] : memref<16x128xf32, #tpu.memory_space<vmem>>, vector<16x128xf32>
    tpu.vector_store %arg13[%c0_9, %c0_10], %15 {strides = array<i32>} : memref<16x128xf32, #tpu.memory_space<vmem>>, vector<16x128xf32>,
    %c0_11 = arith.constant 0 : index
    %c0_12 = arith.constant 0 : index
    %17 = vector.load %arg14[%c0_11, %c0_12] : memref<16x128xf32, #tpu.memory_space<vmem>>, vector<16x128xf32>
    %18 = arith.index_cast %4 : i32 to index
    %19 = memref.load %arg4[%18] : memref<5xf32, #tpu.memory_space<smem>>
    %20 = vector.extract_strided_slice %8 {offsets = [0, 128], sizes = [16, 128], strides = [1, 1]} : vector<16x256xf32> to vector<16x128xf32>
    %21 = vector.broadcast %19 : f32 to vector<16x128xf32>
    %22 = arith.mulf %21, %20 : vector<16x128xf32>
    %23 = arith.addf %17, %22 : vector<16x128xf32>
    %c0_13 = arith.constant 0 : index
    %c0_14 = arith.constant 0 : index
    %24 = vector.load %arg14[%c0_13, %c0_14] : memref<16x128xf32, #tpu.memory_space<vmem>>, vector<16x128xf32>
    tpu.vector_store %arg14[%c0_13, %c0_14], %23 {strides = array<i32>} : memref<16x128xf32, #tpu.memory_space<vmem>>, vector<16x128xf32>,
    %c4_i32 = arith.constant 4 : i32
    %25 = arith.cmpi eq, %arg1, %c4_i32 : i32
    %26 = arith.extui %25 : i1 to i32
    %c0_i32_15 = arith.constant 0 : i32
    %27 = arith.cmpi ne, %26, %c0_i32_15 : i32
    scf.if %27 {
      %c0_16 = arith.constant 0 : index
      %c0_17 = arith.constant 0 : index
      %28 = vector.load %arg13[%c0_16, %c0_17] : memref<16x128xf32, #tpu.memory_space<vmem>>, vector<16x128xf32>
      %c0_18 = arith.constant 0 : index
      %c0_19 = arith.constant 0 : index
      %29 = vector.load %arg6[%c0_18, %c0_19] : memref<1x128xf32, #tpu.memory_space<vmem>>, vector<1x128xf32>
      %30 = vector.broadcast %29 : vector<1x128xf32> to vector<16x128xf32>
      %31 = arith.addf %28, %30 : vector<16x128xf32>
      %c0_20 = arith.constant 0 : index
      %c0_21 = arith.constant 0 : index
      %32 = vector.load %arg14[%c0_20, %c0_21] : memref<16x128xf32, #tpu.memory_space<vmem>>, vector<16x128xf32>
      %c0_22 = arith.constant 0 : index
      %c0_23 = arith.constant 0 : index
      %33 = vector.load %arg7[%c0_22, %c0_23] : memref<1x128xf32, #tpu.memory_space<vmem>>, vector<1x128xf32>
      %34 = vector.broadcast %33 : vector<1x128xf32> to vector<16x128xf32>
      %35 = arith.addf %32, %34 : vector<16x128xf32>
      %36 = arith.truncf %31 : vector<16x128xf32> to vector<16x128xbf16>
      %c0_24 = arith.constant 0 : index
      %c0_25 = arith.constant 0 : index
      %37 = vector.load %arg8[%c0_24, %c0_25] : memref<128x4xbf16, #tpu.memory_space<vmem>>, vector<128x4xbf16>
      %cst_26 = arith.constant dense<0.000000e+00> : vector<16x4xf32>
      %38 = tpu.matmul %36, %37, %cst_26 {dimension_numbers = #tpu.dot_dimension_numbers<[1], [0], [0], [1], [0, 0, 1, 1], [], []>} : vector<16x128xbf16>, vector<128x4xbf16>, vector<16x4xf32> -> vector<16x4xf32>
      %c0_27 = arith.constant 0 : index
      %c0_28 = arith.constant 0 : index
      %39 = vector.load %arg9[%c0_27, %c0_28] : memref<1x4xf32, #tpu.memory_space<vmem>>, vector<1x4xf32>
      %40 = vector.broadcast %39 : vector<1x4xf32> to vector<16x4xf32>
      %41 = arith.addf %38, %40 : vector<16x4xf32>
      %cst_29 = arith.constant dense<0xFF800000> : vector<4xf32>
      %42 = vector.multi_reduction <maximumf>, %41, %cst_29 [0] : vector<16x4xf32> to vector<4xf32>
      %43 = vector.shape_cast %42 : vector<4xf32> to vector<1x4xf32>
      %44 = vector.broadcast %43 : vector<1x4xf32> to vector<16x4xf32>
      %45 = arith.subf %41, %44 : vector<16x4xf32>
      %46 = math.exp %45 : vector<16x4xf32>
      %cst_30 = arith.constant dense<0.000000e+00> : vector<4xf32>
      %47 = vector.multi_reduction <add>, %46, %cst_30 [0] : vector<16x4xf32> to vector<4xf32>
      %48 = vector.shape_cast %47 : vector<4xf32> to vector<1x4xf32>
      %49 = tpu.reciprocal %48 {approx = true} : vector<1x4xf32> -> vector<1x4xf32>
      %50 = vector.broadcast %49 : vector<1x4xf32> to vector<16x4xf32>
      %51 = arith.mulf %46, %50 : vector<16x4xf32>
      %cst_31 = arith.constant dense<0.000000e+00> : vector<4x128xf32>
      %52 = tpu.matmul %51, %35, %cst_31 {dimension_numbers = #tpu.dot_dimension_numbers<[0], [0], [1], [1], [0, 1, 1, 1], [], []>} : vector<16x4xf32>, vector<16x128xf32>, vector<4x128xf32> -> vector<4x128xf32>
      %53 = vector.extract_strided_slice %52 {offsets = [0, 0], sizes = [1, 128], strides = [1, 1]} : vector<4x128xf32> to vector<1x128xf32>
      %54 = vector.extract_strided_slice %52 {offsets = [1, 0], sizes = [1, 128], strides = [1, 1]} : vector<4x128xf32> to vector<1x128xf32>
      %55 = vector.extract_strided_slice %52 {offsets = [2, 0], sizes = [1, 128], strides = [1, 1]} : vector<4x128xf32> to vector<1x128xf32>
      %56 = vector.extract_strided_slice %52 {offsets = [3, 0], sizes = [1, 128], strides = [1, 1]} : vector<4x128xf32> to vector<1x128xf32>
      %57 = tpu.concatenate %53, %54, %55, %56 in 1 : vector<1x128xf32>, vector<1x128xf32>, vector<1x128xf32>, vector<1x128xf32> -> vector<1x512xf32>
      %58 = arith.truncf %57 : vector<1x512xf32> to vector<1x512xbf16>
      %c0_32 = arith.constant 0 : index
      %c0_33 = arith.constant 0 : index
      %59 = vector.load %arg10[%c0_32, %c0_33] : memref<512x32xbf16, #tpu.memory_space<vmem>>, vector<512x32xbf16>
      %cst_34 = arith.constant dense<0.000000e+00> : vector<1x32xf32>
      %60 = tpu.matmul %58, %59, %cst_34 {dimension_numbers = #tpu.dot_dimension_numbers<[1], [0], [0], [1], [0, 0, 1, 1], [], []>} : vector<1x512xbf16>, vector<512x32xbf16>, vector<1x32xf32> -> vector<1x32xf32>
      %c0_35 = arith.constant 0 : index
      %c0_36 = arith.constant 0 : index
      %61 = vector.load %arg11[%c0_35, %c0_36] : memref<1x32xf32, #tpu.memory_space<vmem>>, vector<1x32xf32>
      %62 = arith.addf %60, %61 : vector<1x32xf32>
      %63 = vector.shape_cast %62 : vector<1x32xf32> to vector<1x1x32xf32>
      %c0_37 = arith.constant 0 : index
      %c0_38 = arith.constant 0 : index
      %c0_39 = arith.constant 0 : index
      %64 = vector.load %arg12[%c0_37, %c0_38, %c0_39] : memref<1x1x32xf32, #tpu.memory_space<vmem>>, vector<1x1x32xf32>
      tpu.vector_store %arg12[%c0_37, %c0_38, %c0_39], %63 {strides = array<i32>} : memref<1x1x32xf32, #tpu.memory_space<vmem>>, vector<1x1x32xf32>,
    } else {
    }
    return
  }
  func.func @transform_0(%arg0: i32, %arg1: i32) -> (i32, i32, i32, i32) {
    %c0_i32 = arith.constant 0 : i32
    %c0_i32_0 = arith.constant 0 : i32
    %c0_i32_1 = arith.constant 0 : i32
    return %arg0, %arg1, %c0_i32, %c0_i32_0 : i32, i32, i32, i32
  }
  func.func @transform_1(%arg0: i32, %arg1: i32) -> i32 {
    %c0_i32 = arith.constant 0 : i32
    %c0_i32_0 = arith.constant 0 : i32
    return %c0_i32 : i32
  }
  func.func @transform_2(%arg0: i32, %arg1: i32) -> i32 {
    %c0_i32 = arith.constant 0 : i32
    %c0_i32_0 = arith.constant 0 : i32
    return %c0_i32 : i32
  }
  func.func @transform_3(%arg0: i32, %arg1: i32) -> (i32, i32) {
    %c0_i32 = arith.constant 0 : i32
    %c0_i32_0 = arith.constant 0 : i32
    %c0_i32_1 = arith.constant 0 : i32
    return %c0_i32, %c0_i32_0 : i32, i32
  }
  func.func @transform_4(%arg0: i32, %arg1: i32) -> (i32, i32) {
    %c0_i32 = arith.constant 0 : i32
    %c0_i32_0 = arith.constant 0 : i32
    %c0_i32_1 = arith.constant 0 : i32
    return %c0_i32, %c0_i32_0 : i32, i32
  }
  func.func @transform_5(%arg0: i32, %arg1: i32) -> (i32, i32) {
    %c0_i32 = arith.constant 0 : i32
    %c0_i32_0 = arith.constant 0 : i32
    %c0_i32_1 = arith.constant 0 : i32
    return %c0_i32, %c0_i32_0 : i32, i32
  }
  func.func @transform_6(%arg0: i32, %arg1: i32) -> (i32, i32) {
    %c0_i32 = arith.constant 0 : i32
    %c0_i32_0 = arith.constant 0 : i32
    %c0_i32_1 = arith.constant 0 : i32
    return %c0_i32, %c0_i32_0 : i32, i32
  }
  func.func @transform_7(%arg0: i32, %arg1: i32) -> (i32, i32) {
    %c0_i32 = arith.constant 0 : i32
    %c0_i32_0 = arith.constant 0 : i32
    %c0_i32_1 = arith.constant 0 : i32
    return %c0_i32, %c0_i32_0 : i32, i32
  }
  func.func @transform_8(%arg0: i32, %arg1: i32) -> (i32, i32) {
    %c0_i32 = arith.constant 0 : i32
    %c0_i32_0 = arith.constant 0 : i32
    %c0_i32_1 = arith.constant 0 : i32
    return %c0_i32, %c0_i32_0 : i32, i32
  }
  func.func @transform_9(%arg0: i32, %arg1: i32) -> (i32, i32) {
    %c0_i32 = arith.constant 0 : i32
    %c0_i32_0 = arith.constant 0 : i32
    %c0_i32_1 = arith.constant 0 : i32
    return %c0_i32, %c0_i32_0 : i32, i32
  }
  func.func @transform_10(%arg0: i32, %arg1: i32) -> (i32, i32, i32) {
    %c0_i32 = arith.constant 0 : i32
    %c0_i32_0 = arith.constant 0 : i32
    %c0_i32_1 = arith.constant 0 : i32
    return %arg0, %c0_i32, %c0_i32_0 : i32, i32, i32
  }
}

</mosaic_0001>

<bundles_post_ra>
// kernel: tpu_custom_call.1
= control target key start
LH: loop header
LB: loop body
LE: loop exit
PB: predicated region body
PF: predicated region fallthrough
CT: control target
= control target key end

     0   :  { %15 = vsyncpa [#allocation6], 0  ;;  %s2062_s0 = inlined_call_operand.vmem [shape: bf16[2,5,16,32], index: 0, kind: input, shape index: {}]   ;;  %s2063_s1 = inlined_call_operand.vmem [shape: f32[5], index: 1, kind: input, shape index: {}]   ;;  %s2064_s2 = inlined_call_operand.vmem [shape: f32[5], index: 2, kind: input, shape index: {}]   ;;  %s2065_s3 = inlined_call_operand.vmem [shape: bf16[32,256], index: 3, kind: input, shape index: {}]   ;;  %s2066_s4 = inlined_call_operand.vmem [shape: f32[1,128], index: 4, kind: input, shape index: {}]   ;;  %s2067_s5 = inlined_call_operand.vmem [shape: f32[1,128], index: 5, kind: input, shape index: {}]   ;;  %s2068_s6 = inlined_call_operand.vmem [shape: bf16[128,4], index: 6, kind: input, shape index: {}]   ;;  %s2069_s7 = inlined_call_operand.vmem [shape: f32[1,4], index: 7, kind: input, shape index: {}]   ;;  %s2070_s8 = inlined_call_operand.vmem [shape: bf16[512,32], index: 8, kind: input, shape index: {}]   ;;  %s2071_s9 = inlined_call_operand.vmem [shape: f32[1,32], index: 9, kind: input, shape index: {}]   ;;  %s2072_s10 = inlined_call_operand.hbm [shape: f32[2,1,32], index: 10, kind: output, shape index: {}]  }
   0x1   :  { %16 = vsyncpa [#allocation8], 0 }
   0x2   :  { %17 = vsyncpa [#allocation5], 0 }
   0x3   :  { %19 = vsyncpa [#allocation5 + $0x1], 0  ;;  %s1743_s13 = smov 0   ;;  %s1745_s14 = smov 0  }
   0x4   :  { %s1747_s15 = smov 0   ;;  %s1749_s16 = smov 0  }
   0x5   :  { %s1751_s17 = smov 0   ;;  %s1753_s18 = smov 0  }
   0x6   :  { %s1755_s19 = smov 0   ;;  %s1757_s20 = smov 0  }
   0x7 LB: > { %2080 = sst [smem:[#allocation13_spill]] %s1671_s18  ;;  %s1250_s21 = sadd.s32 4294967295, %s1679_s20   ;;  %s1679_s20 = sphi %s1757_s20, %s25_s20   ;;  %s1675_s19 = sphi %s1755_s19, %s2096_s19   ;;  %s1671_s18 = sphi %s1753_s18, %s2095_s18   ;;  %s1667_s17 = sphi %s1751_s17, %s2094_s17   ;;  %s1663_s16 = sphi %s1749_s16, %s2093_s16   ;;  %s1659_s15 = sphi %s1747_s15, %s2099_s15   ;;  %s1655_s14 = sphi %s1745_s14, %s2098_s14   ;;  %s1651_s13 = sphi %s1743_s13, %s2097_s13  }
   0x8   : > { %2081 = sst [smem:[#allocation14_spill]] %s1675_s19  ;;  %s1251_s22 = sadd.s32 4294967294, %s1679_s20  }
   0x9   : > { %s34_s23 = sadd.s32 1, %s1671_s18  ;;  %s37_s24 = sadd.s32 1, %s1675_s19 }
   0xa   : > { %p35_p0 = scmp.ge.s32.totalorder %s34_s23, 5  ;;  %s261_s25 = sadd.s32 1, %s1659_s15 }
   0xb   : > { %p271_p1 = scmp.ne.s32.totalorder %s1659_s15, %s1655_s14  ;;  %p272_p2 = scmp.eq.s32.totalorder %s1250_s21, 9 }
   0xc   : > { %s2101_s23 = smov (%p35_p0, %s34_s23), 0  ;;  %s2103_s24 = smov (!%p35_p0, %s37_s24), %s1675_s19 }
   0xd   : > { %2082 = sst [smem:[#allocation15_spill]] %s2101_s23  ;;  %p1793_p3 = por %p272_p2, %p271_p1 }
   0xe   : > { %p277_p4 = scmp.ne.s32.totalorder %s1655_s14, %s1651_s13  ;;  %p39_p5 = scmp.ge.s32.totalorder %s2103_s24, 2 }
   0xf   : > { %s2083_s26 = scalar_select %p1793_p3, 1, 0 }
  0x10   : > { %p278_p6 = scmp.eq.s32.totalorder %s1251_s22, 9  ;;  %p1252_p7 = scmp.ge.s32.totalorder %s1679_s20, 1 }
  0x11   : > { %p285_p8 = scmp.lt.s32.totalorder %s1679_s20, 11  ;;  %s2105_s24 = smov (%p39_p5, %s2103_s24), 0 }
  0x12   : > { %2084 = sst [smem:[#allocation16_spill]] %s2105_s24  ;;  %p1803_p9 = por %p278_p6, %p277_p4 }
  0x13   : > { %p1807_p10 = pnand %p1252_p7, %p285_p8  ;;  %s258_s29 = ssub.s32 %s1675_s19, %s2105_s24 }
  0x14   : > { %s2085_s27 = scalar_select %p1803_p9, 1, 0 }
  0x15   : > { %s2086_s28 = scalar_select %p1807_p10, 1, 0 }
  0x16   : > { %p259_p11 = scmp.eq.s32.totalorder %s258_s29, 0  ;;  %p1410_p12 = pneg %p1807_p10 }
  0x17   : > { %p1815_p13 = scmp.eq.s32.totalorder %s1250_s21, 0  ;;  %s298_s22 = sshll.u32 %s2063_s1, 4  ;;  %s299_s22 = int_to_ptr.vmem [resolvable:$true] %s298_s22 }
  0x18   : > { %s1823_s23 = scalar_select %p259_p11, %s1659_s15, %s261_s25  }
  0x19   : > { %s2087_s30 = scalar_select %p1815_p13, 1, 0 }
  0x1a   : > { %p1827_p0 = pnand %p1815_p13, %p1410_p12  ;;  %s309_s21 = sshll.u32 %s2064_s2, 4  ;;  %s310_s21 = int_to_ptr.vmem [resolvable:$true] %s309_s21 }
  0x1b   : > { %s1549_s19 = scalar_lea.vmem %s299_s22, 16  ;;  %p1557_p6 = scmp.lt.s32.totalorder %s299_s22, %s299_s22 }
  0x1c   : > { %p1550_p1 = scmp.ne.s32.totalorder %s299_s22, %s1549_s19  ;;  %p1551_p2 = pneg %p1827_p0 }
  0x1d   : > { %p1558_p7 = scmp.lt.s32.totalorder %s1549_s19, %s1549_s19 }
  0x1e   : > { %p1552_p4 = pnand %p1551_p2, %p1550_p1 }
  0x1f   : > { %p1559_p8 = por %p1558_p7, %p1557_p6 }
  0x20   : > { %p1553_p5 = pneg %p1552_p4 }
  0x22   : > { %p1560_p11 = pnand %p1559_p8, %p1553_p5 }
  0x24   : > { %1563 = shalt.err (!%p1560_p11)
}
  0x25   : > { %s1681_s25 = smov [#allocation4]   ;;  %s1564_s11 = scalar_lea.vmem %s310_s21, 16 }
  0x26   : > { %1413 = dma.vmem_to_smem (!%p1827_p0), %s299_s22, 16, %s1681_s25, [#allocation6]  }
  0x27   : > { %p1565_p12 = scmp.ne.s32.totalorder %s310_s21, %s1564_s11  ;;  %p1572_p13 = scmp.lt.s32.totalorder %s310_s21, %s310_s21 }
  0x28   : > { %p1573_p10 = scmp.lt.s32.totalorder %s1564_s11, %s1564_s11 }
  0x29   : > { %p1567_p9 = pnand %p1565_p12, %p1551_p2 }
  0x2a   : > { %p1574_p1 = por %p1573_p10, %p1572_p13 }
  0x2b   : > { %p1568_p3 = pneg %p1567_p9 }
  0x2d   : > { %p1575_p4 = pnand %p1574_p1, %p1568_p3 }
  0x2f   : > { %1578 = shalt.err (!%p1575_p4)
}
  0x30   : > { %s1682_s24 = smov [#allocation7]   ;;  %p2089_p5 = scmp.ne.s32.totalorder %s2086_s28, 0 }
  0x31   : > { %1416 = dma.vmem_to_smem (!%p1827_p0), %s310_s21, 16, %s1682_s24, [#allocation8]  }
  0x32   : > { %355 = sbr.rel (%p2089_p5) target bundleno = 1133 (0x46d), region = 60  ;;  %p2090_p6 = scmp.ne.s32.totalorder (!%p2089_p5), %s2087_s30, 0 }
  0x37   : > { %1638 = dma.done.wait (%p2090_p6), [#allocation6], 16  }
  0x38   : > { %1640 = vsyncadd (%p2090_p6), [#allocation6], 4294967280 }
  0x39   : > { %1642 = dma.done.wait (%p2090_p6), [#allocation8], 16  }
  0x3a   : > { %1644 = vsyncadd (%p2090_p6), [#allocation8], 4294967280 }
  0x3b   : > { %365 = sfence }
  0x3c   : > { %s399_s18 = sand.u32 1, %s1655_s14   ;;  %p401_p3 = scmp.lt.s32.totalorder %s1667_s17, 1 }
  0x3d   : > { %p403_p9 = scmp.lt.s32.totalorder %s1663_s16, 4  ;;  %s1860_s24 = scalar_lea.vmem [#allocation9], %s399_s18 }
  0x3e   : > { %s402_s19 = scalar_select %p401_p3, %s1667_s17, 1 }
  0x3f   : > { %s404_s28 = scalar_select %p403_p9, %s1663_s16, 4 }
  0x40   : > { %s1399_s12 = smul.u32 10, %s402_s19  ;;  %p1261_p10 = scmp.ne.s32.totalorder %s1663_s16, 0 }
  0x41   : > { %s1259_s22 = sshll.u32 %s404_s28, 1 }
  0x42   : > { %s407_s29 = sadd.s32 %s1399_s12, %s1259_s22  ;;  %414 = sbr.rel (%p1261_p10) target bundleno = 74 (0x4a), region = 72 }
  0x43   : > { %s1260_s21 = sshll.u32 %s407_s29, 2 }
  0x44   : > { %s409_s30 = scalar_lea.vmem %s2062_s0, %s1260_s21 }
  0x47   : > { %v1683_v0 = vmov 0.0  }
  0x48   : > { %415 = vst [vmem:[#allocation2] sm:$0xff] %v1683_v0  ;;  %416 = vst [vmem:[#allocation2 + $0x8] sm:$0xff] %v1683_v0 }
  0x49   : > { %417 = vst [vmem:[#allocation3 + $0x8] sm:$0xff] %v1683_v0  ;;  %418 = vst [vmem:[#allocation3] sm:$0xff] %v1683_v0 }
  0x4a PF: > { %v1496_v1 = vld [vmem:[%s2065_s3 + $0x14] ss:$8 sps:$4 sm:$0xff]   ;;  %v1498_v2 = vld [vmem:[%s2065_s3 + $0x10] ss:$8 sps:$4 sm:$0xff]   ;;  %v1684_v3 = vmov 0   ;;  %v1502_v6 = vld [vmem:[%s409_s30] sm:$0xff]  }
  0x4b   : > { %486 = vmatprep.mubr.bf16.mxu0 %v1684_v3  ;;  %466 = vmatprep.subr.bf16.mxu0 %v1496_v1  ;;  %v1499_v4 = vld [vmem:[%s2065_s3 + $0x4] ss:$8 sps:$4 sm:$0xff]   ;;  %v1501_v5 = vld [vmem:[%s2065_s3] ss:$8 sps:$4 sm:$0xff]   ;;  %vm450_vm0 = vcmask 261120   ;;  %s499_s19 = sld [smem:[#allocation4 + %s1663_s16]] }
  0x4c   : > { %467 = vmatpush1.bf16.msra.mxu0 %v1498_v2  ;;  %s509_s28 = sld [smem:[#allocation7 + %s1663_s16]]  ;;  %p1268_p13 = scmp.ne.s32.totalorder %s1663_s16, 4 }
  0x4d   : > { %468 = vmatprep.subr.bf16.mxu0 %v1499_v4 }
  0x4f   : > { %v497_v9 = vld [vmem:[#allocation2] sm:$0xff]  ;;  %v498_v17 = vld [vmem:[#allocation2 + $0x8] sm:$0xff] }
  0x50   : > { %469 = vmatpush1.bf16.msra.mxu0 %v1501_v5  ;;  %v507_v13 = vld [vmem:[#allocation3 + $0x8] sm:$0xff]  ;;  %v508_v21 = vld [vmem:[#allocation3] sm:$0xff] }
  0x51   : > { %v500_v7 = vstv %s499_s19 }
  0x52   : > { %v510_v10 = vstv %s509_s28 }
  0x53   : > { %1267 = vmatmul.mubr.msk.bf16.vlgmr.msra.gmra.mxu0 %vm450_vm0, %v1502_v6 }
 0x113   : > { %v488_v8 = vpop.f32.mrf.mxu0 }
 0x114   : > { %v501_v11 = vmul.f32 %v500_v7, %v488_v8 }
 0x115   : > { %v490_v12 = vpop.f32.mrf.mxu0 }
 0x116   : > { %v503_v14 = vadd.f32 %v501_v11, %v497_v9  ;;  %v511_v15 = vmul.f32 %v510_v10, %v490_v12 }
 0x117   : > { %v492_v16 = vpop.f32.mrf.mxu0 }
 0x118   : > { %505 = vst [vmem:[#allocation2] sm:$0xff] %v503_v14  ;;  %v513_v18 = vadd.f32 %v511_v15, %v507_v13  ;;  %v502_v19 = vmul.f32 %v500_v7, %v492_v16 }
 0x119   : > { %v494_v20 = vpop.f32.mrf.mxu0 }
 0x11a   : > { %515 = vst [vmem:[#allocation3 + $0x8] sm:$0xff] %v513_v18  ;;  %v504_v22 = vadd.f32 %v502_v19, %v498_v17  ;;  %v512_v23 = vmul.f32 %v510_v10, %v494_v20  ;;  %520 = sbr.rel (%p1268_p13) target bundleno = 1109 (0x455), region = 76 }
 0x11c   : > { %506 = vst [vmem:[#allocation2 + $0x8] sm:$0xff] %v504_v22  ;;  %v514_v24 = vadd.f32 %v512_v23, %v508_v21 }
 0x11e   : > { %516 = vst [vmem:[#allocation3] sm:$0xff] %v514_v24 }
 0x11f   : > { %v1503_v25 = vld [vmem:[%s2068_s6 + $0x38] sm:$0xff]   ;;  %v1685_v26 = vmov 0.0   ;;  %v1504_v27 = vld [vmem:[%s2068_s6 + $0x30] sm:$0xff]   ;;  %vm1686_vm1 = vmmov 0   ;;  %v1505_v28 = vld [vmem:[%s2068_s6 + $0x28] sm:$0xff]   ;;  %vm656_vm2 = vcmask 31744  }
 0x120   : > { %1372 = vmatprep.subr.bf16.mxu0 %v1685_v26  ;;  %1392 = vmatprep.subr.mxu1 %v1685_v26  ;;  %v1506_v29 = vld [vmem:[%s2068_s6 + $0x20] sm:$0xff]   ;;  %v1507_v30 = vld [vmem:[%s2068_s6 + $0x18] sm:$0xff]   ;;  %v1508_v31 = vld [vmem:[%s2068_s6 + $0x10] sm:$0xff]   ;;  %vm716_vm3 = vcmask 130048   ;;  %vm1138_vm4 = vcmask 253952  }
 0x121   : > { %1373 = vmatpush3.bf16.msra.mxu0 %v1503_v25  ;;  %1388 = vmatprep.mubr.msk.bf16.mxu0 %vm1686_vm1, %v1685_v26  ;;  %v1509_v32 = vld [vmem:[%s2068_s6 + $0x8] sm:$0xff]   ;;  %v521_v33 = vld [vmem:[#allocation2] sm:$0xff]  ;;  %v532_v40 = vld [vmem:[#allocation3 + $0x8] sm:$0xff] }
 0x122   : > { %1374 = vmatprep.subr.bf16.mxu0 %v1685_v26  ;;  %1396 = vmatprep.mubr.msk.f32.mxu1 %vm1686_vm1, %v1685_v26  ;;  %v1269_v35 = vld [vmem:[%s2066_s4] ss:$0 sm:$0xff]  ;;  %v1511_v13 = vld [vmem:[%s2070_s8 + $0x78] sm:$0xff]   ;;  %v1516_v17 = vld [vmem:[%s2070_s8 + $0xf0] sm:$0xff]  }
 0x123   : > { %v522_v34 = vld [vmem:[#allocation2 + $0x8] sm:$0xff]  ;;  %v1510_v36 = vld [vmem:[%s2068_s6] sm:$0xff]   ;;  %v530_v37 = vadd.f32 %v1269_v35, %v521_v33  ;;  %v1512_v14 = vld [vmem:[%s2070_s8 + $0xf8] sm:$0xff]  }
 0x124   : > { %v531_v38 = vadd.f32 %v1269_v35, %v522_v34  ;;  %v1270_v42 = vld [vmem:[%s2067_s5] ss:$0 sm:$0xff]  ;;  %v1514_v16 = vld [vmem:[%s2070_s8 + $0xb8] sm:$0xff]   ;;  %v1518_v19 = vld [vmem:[%s2070_s8 + $0xb0] sm:$0xff]  }
 0x125   : > { %1375 = vmatpush3.bf16.msra.mxu0 %v1504_v27  ;;  %v533_v41 = vld [vmem:[#allocation3] sm:$0xff]  ;;  %v541_v43 = vadd.f32 %v1270_v42, %v532_v40  ;;  %v1271_v45 = vld [vmem:[%s2069_s7] ss:$0 sm:$0xff]  ;;  %v1520_v20 = vld [vmem:[%s2070_s8 + $0xe8] sm:$0xff]  }
 0x126   : > { %1376 = vmatprep.subr.bf16.mxu0 %v1685_v26  ;;  %v543_v39 = vpack.c.bf16 %v531_v38, %v530_v37  ;;  %v542_v44 = vadd.f32 %v1270_v42, %v533_v41  ;;  %v1522_v21 = vld [vmem:[%s2070_s8 + $0xa8] sm:$0xff]   ;;  %v1524_v22 = vld [vmem:[%s2070_s8 + $0xe0] sm:$0xff]   ;;  %v1528_v24 = vld [vmem:[%s2070_s8 + $0xd8] sm:$0xff]  }
 0x127   : > { %v1526_v23 = vld [vmem:[%s2070_s8 + $0xa0] sm:$0xff]   ;;  %v1530_v25 = vld [vmem:[%s2070_s8 + $0x98] sm:$0xff]   ;;  %v1534_v27 = vld [vmem:[%s2070_s8 + $0x90] sm:$0xff]  }
 0x128   : > { %1393 = vmatpush3.msra.mxu1 %v542_v44  ;;  %v1517_v33 = vld [vmem:[%s2070_s8 + $0x30] sm:$0xff]   ;;  %v1519_v34 = vld [vmem:[%s2070_s8 + $0x68] sm:$0xff]   ;;  %v1525_v37 = vld [vmem:[%s2070_s8 + $0x20] sm:$0xff]  }
 0x129   : > { %1377 = vmatpush3.bf16.msra.mxu0 %v1505_v28  ;;  %1394 = vmatprep.subr.mxu1 %v1685_v26  ;;  %v1536_v28 = vld [vmem:[%s2070_s8 + $0xc8] sm:$0xff]   ;;  %v1527_v38 = vld [vmem:[%s2070_s8 + $0x58] sm:$0xff]   ;;  %v1531_v40 = vld [vmem:[%s2070_s8 + $0x50] sm:$0xff]  }
 0x12a   : > { %1378 = vmatprep.subr.bf16.mxu0 %v1685_v26  ;;  %1395 = vmatpush3.msra.mxu1 %v541_v43  ;;  %v1521_v35 = vld [vmem:[%s2070_s8 + $0x28] sm:$0xff]   ;;  %v1533_v41 = vld [vmem:[%s2070_s8 + $0x10] sm:$0xff]   ;;  %v1539_v44 = vld [vmem:[%s2070_s8 + $0x40] sm:$0xff]  }
 0x12b   : > { %1328 = vmatprep.subr.bf16.mxu1 %v1511_v13  ;;  %v1535_v42 = vld [vmem:[%s2070_s8 + $0x48] sm:$0xff]  }
 0x12c   : > { %v1537_v43 = vld [vmem:[%s2070_s8 + $0x8] sm:$0xff]  }
 0x12d   : > { %1379 = vmatpush3.bf16.msra.mxu0 %v1506_v29  ;;  %v1538_v29 = vld [vmem:[%s2070_s8 + $0x88] sm:$0xff]  }
 0x12e   : > { %1380 = vmatprep.subr.bf16.mxu0 %v1685_v26 }
 0x131   : > { %1381 = vmatpush3.bf16.msra.mxu0 %v1507_v30  ;;  %v1513_v30 = vld [vmem:[%s2070_s8 + $0x38] sm:$0xff]  }
 0x132   : > { %1382 = vmatprep.subr.bf16.mxu0 %v1685_v26 }
 0x135   : > { %1383 = vmatpush3.bf16.msra.mxu0 %v1508_v31  ;;  %v1515_v31 = vld [vmem:[%s2070_s8 + $0x70] sm:$0xff]  }
 0x136   : > { %1384 = vmatprep.subr.bf16.mxu0 %v1685_v26 }
 0x139   : > { %1385 = vmatpush3.bf16.msra.mxu0 %v1509_v32 }
 0x13a   : > { %1386 = vmatprep.subr.bf16.mxu0 %v1685_v26  ;;  %v1532_v26 = vld [vmem:[%s2070_s8 + $0xd0] sm:$0xff]  }
 0x13d   : > { %1387 = vmatpush3.bf16.msra.mxu0 %v1510_v36  ;;  %v1523_v36 = vld [vmem:[%s2070_s8 + $0x60] sm:$0xff]  }
 0x13e   : > { %1350 = vmatprep.subr.bf16.mxu0 %v1512_v14 }
 0x140   : > { %1389 = vmatmul.mubr.bf16.vlgmr.msra.gmra.mxu0 %v543_v39  ;;  %v1529_v39 = vld [vmem:[%s2070_s8 + $0x18] sm:$0xff]  }
 0x141   : > { %1351 = vmatpush3.bf16.msra.mxu0 %v1514_v16 }
 0x142   : > { %1352 = vmatprep.subr.bf16.mxu0 %v1516_v17 }
 0x145   : > { %1353 = vmatpush3.bf16.msra.mxu0 %v1518_v19 }
 0x146   : > { %1354 = vmatprep.subr.bf16.mxu0 %v1520_v20 }
 0x149   : > { %1355 = vmatpush3.bf16.msra.mxu0 %v1522_v21 }
 0x14a   : > { %1356 = vmatprep.subr.bf16.mxu0 %v1524_v22 }
 0x14d   : > { %1357 = vmatpush3.bf16.msra.mxu0 %v1526_v23 }
 0x14e   : > { %1358 = vmatprep.subr.bf16.mxu0 %v1528_v24 }
 0x151   : > { %1359 = vmatpush3.bf16.msra.mxu0 %v1530_v25 }
 0x152   : > { %1360 = vmatprep.subr.bf16.mxu0 %v1532_v26 }
 0x155   : > { %1361 = vmatpush3.bf16.msra.mxu0 %v1534_v27 }
 0x156   : > { %1362 = vmatprep.subr.bf16.mxu0 %v1536_v28 }
 0x159   : > { %1363 = vmatpush3.bf16.msra.mxu0 %v1538_v29 }
 0x200   : > { %v649_v46 = vpop.f32.mrf.mxu0 }
 0x201   : > { %v650_v48 = vadd.f32 %v1271_v45, %v649_v46  ;;  %v1541_v46 = vld [vmem:[%s2070_s8] sm:$0xff]  }
 0x202   : > { %v1390_v47 = vpop.f32.mrf.mxu0 }
 0x203   : > { %v657_v52 = vsel %vm656_vm2, %v650_v48, -inf  ;;  %v1542_v47 = vld [vmem:[%s2070_s8 + $0x80] sm:$0xff]  }
 0x204   : > { %v652_v49 = vpop.f32.mrf.mxu0 }
 0x205   : > { %v653_v50 = vadd.f32 %v1271_v45, %v652_v49  ;;  %v1540_v45 = vld [vmem:[%s2070_s8 + $0xc0] sm:$0xff]  }
 0x206   : > { %v1391_v51 = vpop.f32.mrf.mxu0  ;;  %1364 = vmatprep.subr.bf16.mxu0 %v1540_v45 }
 0x207   : > { %v658_v53 = vsel %vm656_vm2, %v653_v50, -inf  ;;  %1365 = vmatpush3.bf16.msra.mxu0 %v1542_v47 }
 0x208   : > { %v659_v54 = vmax.f32 %v657_v52, %v658_v53 }
 0x20a   : > { %v660_v55 = vrot.slane %v659_v54, 4 }
 0x20c   : > { %v661_v56 = vmax.f32 %v659_v54, %v660_v55 }
 0x20e   : > { %v662_v57 = vrot.slane %v661_v56, 2 }
 0x210   : > { %v663_v58 = vmax.f32 %v661_v56, %v662_v57 }
 0x212   : > { %v664_v59 = vrot.slane %v663_v58, 1 }
 0x214   : > { %v665_v60 = vmax.f32 %v663_v58, %v664_v59  ;;  %v865_v59 = vld [vmem:[%s2071_s9] sm:$0x1] }
 0x216   : > { %v666_v61 = vsub.f32 %v650_v48, %v665_v60  ;;  %v667_v62 = vsub.f32 %v653_v50, %v665_v60 }
 0x218   : > { %v668_v63 = vmul.f32 1.442695, %v666_v61  ;;  %v670_v0 = vmul.f32 1.442695, %v667_v62 }
 0x21a   : > { %1543 = vpow2.f32 %v668_v63 }
 0x21b   : > { %1545 = vpow2.f32 %v670_v0 }
 0x227   : > { %v1544_v1 = vpop.eup %1543 }
 0x228   : > { %v1546_v2 = vpop.eup %1545  ;;  %v672_v3 = vsel %vm656_vm2, %v1544_v1, 0.0 }
 0x229   : > { %v673_v4 = vsel %vm656_vm2, %v1546_v2, 0.0 }
 0x22a   : > { %v674_v5 = vadd.f32 %v673_v4, %v672_v3 }
 0x22c   : > { %v675_v6 = vrot.slane %v674_v5, 4 }
 0x22e   : > { %v676_v7 = vadd.f32 %v675_v6, %v674_v5 }
 0x230   : > { %v677_v8 = vrot.slane %v676_v7, 2 }
 0x232   : > { %v678_v9 = vadd.f32 %v677_v8, %v676_v7 }
 0x234   : > { %v679_v10 = vrot.slane %v678_v9, 1 }
 0x236   : > { %v680_v11 = vadd.f32 %v679_v10, %v678_v9 }
 0x238   : > { %1547 = vrcp.f32 %v680_v11 }
 0x245   : > { %v1548_v12 = vpop.eup %1547 }
 0x246   : > { %v682_v15 = vmul.f32 %v1548_v12, %v1544_v1  ;;  %v683_v18 = vmul.f32 %v1548_v12, %v1546_v2 }
 0x248   : > { %684 = vxpose.xlu0.b32.start [1/2] (short) (narrow) %v682_v15, 8 }
 0x24c   : > { %685 = vxpose.xlu0.b32.end [2/2] (short) (narrow) %v683_v18, 8 }
 0x2c4   : > { %v700_v32 = vpop.trf.xlu0 }
 0x2c5   : > { %1397 = vmatmul.mubr.msk.f32.vlgmr.msra.gmra.mxu1 %vm716_vm3, %v700_v32 }
 0x2c6   : > { %1329 = vmatpush3.bf16.msra.mxu1 %v1513_v30 }
 0x2c7   : > { %1330 = vmatprep.subr.bf16.mxu1 %v1515_v31 }
 0x2ca   : > { %1331 = vmatpush3.bf16.msra.mxu1 %v1517_v33 }
 0x2cb   : > { %1332 = vmatprep.subr.bf16.mxu1 %v1519_v34 }
 0x2ce   : > { %1333 = vmatpush3.bf16.msra.mxu1 %v1521_v35 }
 0x2cf   : > { %1334 = vmatprep.subr.bf16.mxu1 %v1523_v36 }
 0x2d2   : > { %1335 = vmatpush3.bf16.msra.mxu1 %v1525_v37 }
 0x2d3   : > { %1336 = vmatprep.subr.bf16.mxu1 %v1527_v38 }
 0x2d6   : > { %1337 = vmatpush3.bf16.msra.mxu1 %v1529_v39 }
 0x2d7   : > { %1338 = vmatprep.subr.bf16.mxu1 %v1531_v40 }
 0x2da   : > { %1339 = vmatpush3.bf16.msra.mxu1 %v1533_v41 }
 0x2db   : > { %1340 = vmatprep.subr.bf16.mxu1 %v1535_v42 }
 0x2de   : > { %1341 = vmatpush3.bf16.msra.mxu1 %v1537_v43 }
 0x2df   : > { %1342 = vmatprep.subr.bf16.mxu1 %v1539_v44 }
 0x2e2   : > { %1343 = vmatpush3.bf16.msra.mxu1 %v1541_v46 }
 0x385   : > { %v786_v48 = vpop.f32.mrf.mxu1 }
 0x386   : > { %v793_v49 = vrot.slane %v786_v48, 2  ;;  %v791_v50 = vrot.slane %v786_v48, 1  ;;  %v795_v51 = vrot.slane %v786_v48, 3  ;;  %v797_v56 = vpack.c.bf16 %v786_v48, %v786_v48 }
 0x387   : > { %v1398_v52 = vpop.f32.mrf.mxu1 }
 0x388   : > { %v799_v53 = vpack.c.bf16 %v793_v49, %v793_v49  ;;  %v798_v54 = vpack.c.bf16 %v791_v50, %v791_v50  ;;  %v800_v55 = vpack.c.bf16 %v795_v51, %v795_v51 }
 0x38a   : > { %1090 = vmatprep.mubr.bf16.mxu1 %v798_v54  ;;  %1130 = vmatprep.mubr.bf16.mxu0 %v800_v55 }
 0x38b   : > { %1091 = vmatmul.mubr.bf16.vlgmr.msra.gmra.mxu1 %v797_v56  ;;  %1131 = vmatmul.mubr.bf16.vlgmr.msra.gmra.mxu0 %v799_v53 }
 0x44b   : > { %v1344_v57 = vpop.f32.mrf.mxu1  ;;  %v1366_v58 = vpop.f32.mrf.mxu0 }
 0x44d   : > { %v1345_v60 = vpop.f32.mrf.mxu1  ;;  %v1367_v61 = vpop.f32.mrf.mxu0 }
 0x44e   : > { %v1346_v62 = vadd.f32 %v1345_v60, %v1344_v57  ;;  %v1368_v2 = vadd.f32 %v1367_v61, %v1366_v58 }
 0x44f   : > { %v1347_v63 = vpop.f32.mrf.mxu1  ;;  %v1369_v0 = vpop.f32.mrf.mxu0 }
 0x450   : > { %v1093_v1 = vadd.f32 %v1346_v62, %v865_v59 }
 0x451   : > { %v1348_v3 = vpop.f32.mrf.mxu1  ;;  %v1370_v4 = vpop.f32.mrf.mxu0 }
 0x452   : > { %v1133_v5 = vadd.f32 %v1368_v2, %v1093_v1 }
 0x454   : > { %1139 = vst.msk [vmem:[%s1860_s24] sm:$0x1] %vm1138_vm4, %v1133_v5 }
 0x455 PF: > { %s1313_s19 = sshll.u32 %s1667_s17, 4  ;;  %s1153_s22 = sshll.u32 %s1860_s24, 4  ;;  %s1154_s22 = int_to_ptr.vmem [resolvable:$true] %s1153_s22 }
 0x456   : > { %s1151_s12 = scalar_lea.hbm %s2072_s10, %s1313_s19  ;;  %s1141_s29 = scalar_lea.sflag [#allocation5], %s399_s18 }
 0x457   : > { %s1579_s21 = scalar_lea.vmem %s1154_s22, 16  ;;  %p2091_p2 = scmp.ne.s32.totalorder %s2083_s26, 0 }
 0x458   : > { %p1580_p0 = scmp.ne.s32.totalorder %s1154_s22, %s1579_s21  ;;  %s1687_s16 = smov [#allocation9]  }
 0x459   : > { %s1583_s25 = sshll.u32 %s1687_s16, 4  ;;  %s1584_s25 = int_to_ptr.vmem [resolvable:$false] %s1583_s25 }
 0x45a   : > { %p1581_p7 = pnand %p1580_p0, %p2091_p2  ;;  %s1585_s11 = scalar_lea.vmem %s1584_s25, 32 }
 0x45b   : > { %p1586_p11 = scmp.lt.s32.totalorder %s1154_s22, %s1584_s25  ;;  %p1587_p12 = scmp.lt.s32.totalorder %s1585_s11, %s1579_s21 }
 0x45c   : > { %p1582_p8 = pneg %p1581_p7 }
 0x45d   : > { %p1588_p1 = por %p1587_p12, %p1586_p11 }
 0x45f   : > { %p1589_p4 = pnand %p1588_p1, %p1582_p8 }
 0x461   : > { %1592 = shalt.err (!%p1589_p4)
}
 0x462   : > { %s1593_s17 = scalar_lea.hbm %s1151_s12, 16  ;;  %s1597_s19 = scalar_lea.hbm %s2072_s10, 32 }
 0x463   : > { %p1594_p5 = scmp.ne.s32.totalorder %s1151_s12, %s1593_s17  ;;  %p1598_p9 = scmp.lt.s32.totalorder %s1151_s12, %s2072_s10 }
 0x464   : > { %p1599_p10 = scmp.lt.s32.totalorder %s1597_s19, %s1593_s17 }
 0x465   : > { %p1595_p6 = pnand %p1594_p5, %p2091_p2 }
 0x466   : > { %p1600_p13 = por %p1599_p10, %p1598_p9 }
 0x467   : > { %p1596_p3 = pneg %p1595_p6 }
 0x469   : > { %p1601_p0 = pnand %p1600_p13, %p1596_p3 }
 0x46b   : > { %1604 = shalt.err (!%p1601_p0)
}
 0x46c   : > { %1408 = dma.vmem_to_hbm [thread:$0]  (%p2091_p2), %s1154_s22, 16, %s1151_s12, %s1141_s29  }
 0x46d PF: > { %p1425_p7 = scmp.ge.s32.totalorder %s1679_s20, 2  ;;  %s1165_s21 = sand.u32 1, %s1651_s13  }
 0x46e   : > { %p2092_p8 = scmp.ne.s32.totalorder %s2085_s27, 0  ;;  %s1166_s16 = scalar_lea.sflag [#allocation5], %s1165_s21 }
 0x470   : > { %p1418_p11 = pnand %p1425_p7, %p2092_p8 }
 0x472   : > { %p1419_p12 = pneg %p1418_p11 }
 0x474   : > { %1646 = dma.done.wait (%p1419_p12), %s1166_s16, 16  }
 0x475   : > { %1648 = vsyncadd (%p1419_p12), %s1166_s16, 4294967280  ;;  %s25_s20 = sadd.s32 1, %s1679_s20   ;;  %s2093_s16 = sld [smem:[#allocation13_spill]] }
 0x476   : > { %p22_p1 = scmp.ge.s32.totalorder %s25_s20, 12   ;;  %s2094_s17 = sld [smem:[#allocation14_spill]] }
 0x477   : > { %s2095_s18 = sld [smem:[#allocation15_spill]]  ;;  %s2097_s13 = smov %s1655_s14 }
 0x478   : > { %s2096_s19 = sld [smem:[#allocation16_spill]]  ;;  %s2098_s14 = smov %s1659_s15 }
 0x479   : > { %s2099_s15 = smov %s1823_s23  ;;  %24 = sbr.rel (!%p22_p1) target bundleno = 7 (0x7), region = 112 }
 0x47e   :  { %1170 = vsyncpa [#allocation5], 1 }
 0x47f   :  { %1172 = vsyncpa [#allocation5 + $0x1], 1 }
 0x480   :  { %1173 = vsyncpa [#allocation6], 1 }
 0x481   :  { %1175 = vsyncpa [#allocation6 + $0x1], 1 }
 0x482   :  { %1176 = vsyncpa [#allocation8], 1 }

</bundles_post_ra>
